<compile_context>
chip_gen: v7x
topology: tpu7x:2x2x1
jax: 0.10.0
libtpu: 0.0.40
codegen_flags: <defaults>
</compile_context>

<pallas_src>
import functools

import jax
import jax.numpy as jnp
from jax.experimental import pallas as pl
from jax.experimental.pallas import tpu as pltpu

_LOG_2PI = 1.8378770664093453  # log(2*pi)


def _round_up(x, m):
    return (x + m - 1) // m * m


# ---------------------------------------------------------------------------
# Kernel (everything in the transposed, batch-on-lanes domain)
# ---------------------------------------------------------------------------
def _hvi_kernel(prevt_ref, epst_ref, fslab_ref, rslab_ref, zt_ref, logw_ref,
                *, D, H):
    Dp = _round_up(D, 8)   # sublane-aligned head block height
    Hp = _round_up(H, 8)   # sublane-aligned trunk block height

    prevt = prevt_ref[...]          # (D, TB)  feature on sublanes, batch on lanes
    epst = epst_ref[...]            # (D, TB)

    def refine(xt, slab_ref):
        # packed, transposed, sublane-aligned parameters
        w1t = slab_ref[0:H, 0:D]                               # (H, D)   W1^T
        b1t = slab_ref[Hp:Hp + H, 0:1]                         # (H, 1)   b1 column
        wmst = slab_ref[2 * Hp:2 * Hp + 2 * Dp, 0:H]           # (2Dp, H) [Wmu;Wsig]^T
        bmst = slab_ref[2 * Hp + 2 * Dp:2 * Hp + 4 * Dp, 0:1]  # (2Dp, 1)

        # trunk: Linear + ReLU   (h^T = W1^T @ x^T + b1)
        ht = jnp.dot(w1t, xt, preferred_element_type=jnp.float32) + b1t
        ht = jnp.maximum(ht, 0.0)
        # fused mu|sigma heads, one matmul; split is sublane-aligned (rows 0 / Dp)
        mst = jnp.dot(wmst, ht, preferred_element_type=jnp.float32) + bmst
        mut = mst[0:D, :]                                      # (D, TB)
        sigt = jnp.logaddexp(mst[Dp:Dp + D, :], 0.0)           # softplus, (D, TB)
        return mut, sigt

    def normal_logprob_sum(vt, mut, sigt):
        inv_sigma = pl.reciprocal(sigt, approx=False)          # exact (1e-4 tol)
        t = (vt - mut) * inv_sigma
        lp = -0.5 * t * t - jnp.log(sigt) - 0.5 * _LOG_2PI
        return jnp.sum(lp, axis=0, keepdims=True)              # (1, TB)

    # forward transition: sample z and score it
    mu_f, sig_f = refine(prevt, fslab_ref)
    zt = mu_f + epst * sig_f
    log_forward = normal_logprob_sum(zt, mu_f, sig_f)

    # reverse transition: score previous_z under q(prev | z)
    mu_r, sig_r = refine(zt, rslab_ref)
    log_reverse = normal_logprob_sum(prevt, mu_r, sig_r)

    zt_ref[...] = zt                                           # (D, TB), lane-dense
    logw_ref[...] = log_forward - log_reverse                  # (1, TB), lane-dense


# ---------------------------------------------------------------------------
# Host-side parameter packing: one padded, TRANSPOSED f32 slab per module
#   rows [0, Hp)            : W1^T (H, D)
#   rows [Hp, 2Hp)          : b1 column (H, 1)
#   rows [2Hp, 2Hp+2Dp)     : mu head W^T at [0, D), sigma head W^T at [Dp, Dp+D)
#   rows [2Hp+2Dp, 2Hp+4Dp) : mu bias col at [0, D), sigma bias col at [Dp, Dp+D)
# ---------------------------------------------------------------------------
def _pack_module_t(w1, b1, wm, bm, ws, bs):
    D, H = w1.shape
    # shape-consistency asserts (packing assumptions)
    assert b1.shape == (1, H), b1.shape
    assert wm.shape == (H, D) and ws.shape == (H, D), (wm.shape, ws.shape)
    assert bm.shape == (1, D) and bs.shape == (1, D), (bm.shape, bs.shape)

    Dp = _round_up(D, 8)
    Hp = _round_up(H, 8)
    W = _round_up(max(D, H), 128)
    R = 2 * Hp + 4 * Dp
    f32 = jnp.float32

    slab = jnp.zeros((R, W), f32)
    slab = slab.at[0:H, 0:D].set(w1.astype(f32).T)                 # W1^T
    slab = slab.at[Hp:Hp + H, 0:1].set(b1.astype(f32).T)           # b1 column
    r0 = 2 * Hp
    slab = slab.at[r0:r0 + D, 0:H].set(wm.astype(f32).T)           # mu head W^T
    slab = slab.at[r0 + Dp:r0 + Dp + D, 0:H].set(ws.astype(f32).T)  # sigma head W^T
    rb = 2 * Hp + 2 * Dp
    slab = slab.at[rb:rb + D, 0:1].set(bm.astype(f32).T)           # mu bias col
    slab = slab.at[rb + Dp:rb + Dp + D, 0:1].set(bs.astype(f32).T)  # sigma bias col
    return slab


# ---------------------------------------------------------------------------
# Batch-tile selection
# ---------------------------------------------------------------------------
def _choose_batch_tile(B, tb):
    TB = min(max(tb, 128), _round_up(B, 128))
    TB = _round_up(TB, 128)                      # lane-dense blocks
    Bp = _round_up(B, TB)
    n = Bp // TB
    # v7x has 2 TensorCores: prefer >= 2 "parallel" grid steps when possible.
    if n == 1 and TB > 128:
        TB = _round_up(TB // 2, 128)
        Bp = _round_up(B, TB)
        n = Bp // TB
    return TB, Bp, n


# ---------------------------------------------------------------------------
# Wrappers
# ---------------------------------------------------------------------------
def hvi_transition_forward_t(prev_t, eps_t, params, *, tb=512):
    """Native batch-on-lanes entry point (no transposes anywhere).

    prev_t, eps_t: [D, B] f32 (feature-major).  Returns (z_t [D, B], logw [B]).
    """
    D, B = prev_t.shape
    H = params["w1f"].shape[1]
    assert params["w1f"].shape[0] == D

    TB, Bp, n_tiles = _choose_batch_tile(B, tb)
    if Bp != B:
        pad = Bp - B
        # zero padding keeps sigma = softplus(bias) > 0 on padded lanes (no NaNs)
        prev_t = jnp.pad(prev_t, ((0, 0), (0, pad)))
        eps_t = jnp.pad(eps_t, ((0, 0), (0, pad)))

    fslab = _pack_module_t(params["w1f"], params["b1f"], params["wmf"],
                           params["bmf"], params["wsf"], params["bsf"])
    rslab = _pack_module_t(params["w1r"], params["b1r"], params["wmr"],
                           params["bmr"], params["wsr"], params["bsr"])

    kernel = functools.partial(_hvi_kernel, D=D, H=H)
    Dp = _round_up(D, 8)

    # advisory cost hint for XLA's scheduler
    matmul_flops = 2 * 2 * Bp * (D * H + 2 * Dp * H)   # 2 modules, mul+add
    elem_flops = 30 * Bp * D
    transcendentals = 8 * Bp * D
    bytes_accessed = 4 * (3 * Bp * D + Bp + fslab.size + rslab.size)

    z_t, logw = pl.pallas_call(
        kernel,
        grid=(n_tiles,),
        in_specs=[
            pl.BlockSpec((D, TB), lambda i: (0, i)),       # previous_z^T
            pl.BlockSpec((D, TB), lambda i: (0, i)),       # eps^T
            pl.BlockSpec(fslab.shape, lambda i: (0, 0)),   # fwd params slab
            pl.BlockSpec(rslab.shape, lambda i: (0, 0)),   # rev params slab
        ],
        out_specs=[
            pl.BlockSpec((D, TB), lambda i: (0, i)),       # z^T (lane-dense)
            pl.BlockSpec((1, TB), lambda i: (0, i)),       # log-weight row
        ],
        out_shape=(
            jax.ShapeDtypeStruct((D, Bp), jnp.float32),
            jax.ShapeDtypeStruct((1, Bp), jnp.float32),
        ),
        compiler_params=pltpu.CompilerParams(
            dimension_semantics=("parallel",),
            vmem_limit_bytes=32 * 1024 * 1024),
        cost_estimate=pl.CostEstimate(
            flops=matmul_flops + elem_flops,
            transcendentals=transcendentals,
            bytes_accessed=bytes_accessed),
    )(prev_t, eps_t, fslab, rslab)

    return z_t[:, :B], logw[0, :B]


def hvi_transition_forward(previous_z, eps, params, *, tb=512):
    """PyTorch-shaped convenience wrapper: previous_z, eps are [B, D] f32.

    The two boundary transposes are tiny XLA ops; callers that can keep the
    latent feature-major should use hvi_transition_forward_t directly.
    """
    z_t, logw = hvi_transition_forward_t(previous_z.T, eps.T, params, tb=tb)
    return z_t.T, logw


# ---------------------------------------------------------------------------
# Pure-JAX reference (correctness check)
# ---------------------------------------------------------------------------
def _reference(previous_z, eps, p):
    def refine(inp, w1, b1, wm, bm, ws, bs):
        h = jnp.maximum(inp @ w1 + b1, 0.0)
        mu = h @ wm + bm
        sigma = jax.nn.softplus(h @ ws + bs)
        return mu, sigma

    def lp_sum(v, mu, sigma):
        return jnp.sum(-0.5 * ((v - mu) / sigma) ** 2 - jnp.log(sigma)
                       - 0.5 * _LOG_2PI, axis=1)

    mu_f, sig_f = refine(previous_z, p["w1f"], p["b1f"], p["wmf"], p["bmf"],
                         p["wsf"], p["bsf"])
    z = mu_f + eps * sig_f
    log_f = lp_sum(z, mu_f, sig_f)
    mu_r, sig_r = refine(z, p["w1r"], p["b1r"], p["wmr"], p["bmr"],
                         p["wsr"], p["bsr"])
    log_r = lp_sum(previous_z, mu_r, sig_r)
    return z, log_f - log_r


def _init_params(key, D, H):
    ks = jax.random.split(key, 12)
    s_in = 1.0 / jnp.sqrt(D)
    s_h = 1.0 / jnp.sqrt(H)
    return {
        # forward module
        "w1f": jax.random.uniform(ks[0], (D, H), jnp.float32, -s_in, s_in),
        "b1f": jax.random.uniform(ks[1], (1, H), jnp.float32, -s_in, s_in),
        "wmf": jax.random.uniform(ks[2], (H, D), jnp.float32, -s_h, s_h),
        "bmf": jax.random.uniform(ks[3], (1, D), jnp.float32, -s_h, s_h),
        "wsf": jax.random.uniform(ks[4], (H, D), jnp.float32, -s_h, s_h),
        "bsf": jax.random.uniform(ks[5], (1, D), jnp.float32, -s_h, s_h),
        # reverse module
        "w1r": jax.random.uniform(ks[6], (D, H), jnp.float32, -s_in, s_in),
        "b1r": jax.random.uniform(ks[7], (1, H), jnp.float32, -s_in, s_in),
        "wmr": jax.random.uniform(ks[8], (H, D), jnp.float32, -s_h, s_h),
        "bmr": jax.random.uniform(ks[9], (1, D), jnp.float32, -s_h, s_h),
        "wsr": jax.random.uniform(ks[10], (H, D), jnp.float32, -s_h, s_h),
        "bsr": jax.random.uniform(ks[11], (1, D), jnp.float32, -s_h, s_h),
    }


if __name__ == "__main__":
    # batch deliberately NOT a multiple of the tile to exercise lane-padding +
    # a multi-step (2-tile, v7x-friendly) grid: B=200 -> padded 256, grid=(2,)
    B, D, H = 200, 16, 32  # batch, input_dimension, hidden_dimension

    key = jax.random.PRNGKey(0)
    k_prev, k_eps, k_par = jax.random.split(key, 3)
    previous_z = jax.random.normal(k_prev, (B, D), jnp.float32)
    # epsilon (torch.randn_like) is generated outside the kernel and passed in
    eps = jax.random.normal(k_eps, (B, D), jnp.float32)
    params = _init_params(k_par, D, H)

    z, logw = hvi_transition_forward(previous_z, eps, params)
    jax.block_until_ready((z, logw))

    z_ref, logw_ref = _reference(previous_z, eps, params)
    assert z.shape == (B, D) and logw.shape == (B,)
    assert jnp.allclose(z, z_ref, atol=1e-5, rtol=1e-5)
    assert jnp.allclose(logw, logw_ref, atol=1e-4, rtol=1e-4)

    print("KERNEL_OK")
</pallas_src>

<mosaic_0001>
module attributes {stable_mosaic.version = 11 : i64} {
  func.func @_hvi_kernel(%arg0: i32, %arg1: memref<16x128xf32, #tpu.memory_space<vmem>>, %arg2: memref<16x128xf32, #tpu.memory_space<vmem>>, %arg3: memref<128x128xf32, #tpu.memory_space<vmem>>, %arg4: memref<128x128xf32, #tpu.memory_space<vmem>>, %arg5: memref<16x128xf32, #tpu.memory_space<vmem>>, %arg6: memref<1x128xf32, #tpu.memory_space<vmem>>) attributes {dimension_semantics = [#tpu.dimension_semantics<parallel>], iteration_bounds = array<i64: 2>, scalar_prefetch = 0 : i64, scratch_operands = 0 : i64, tpu.core_type = #tpu.core_type<tc>, window_params = [{transform_indices = @transform_0, window_bounds = array<i64: 16, 128>}, {transform_indices = @transform_1, window_bounds = array<i64: 16, 128>}, {pipeline_mode = #tpu.pipeline_mode<synchronous>, transform_indices = @transform_2, window_bounds = array<i64: 128, 128>}, {pipeline_mode = #tpu.pipeline_mode<synchronous>, transform_indices = @transform_3, window_bounds = array<i64: 128, 128>}, {transform_indices = @transform_4, window_bounds = array<i64: 16, 128>}, {transform_indices = @transform_5, window_bounds = array<i64: 1, 128>}]} {
    %c0 = arith.constant 0 : index
    %c0_0 = arith.constant 0 : index
    %0 = vector.load %arg1[%c0, %c0_0] : memref<16x128xf32, #tpu.memory_space<vmem>>, vector<16x128xf32>
    %c0_1 = arith.constant 0 : index
    %c0_2 = arith.constant 0 : index
    %1 = vector.load %arg2[%c0_1, %c0_2] : memref<16x128xf32, #tpu.memory_space<vmem>>, vector<16x128xf32>
    %c0_3 = arith.constant 0 : index
    %c0_4 = arith.constant 0 : index
    %2 = vector.load %arg3[%c0_3, %c0_4] : memref<128x128xf32, #tpu.memory_space<vmem>>, vector<32x16xf32>
    %c32 = arith.constant 32 : index
    %c0_5 = arith.constant 0 : index
    %3 = vector.load %arg3[%c32, %c0_5] : memref<128x128xf32, #tpu.memory_space<vmem>>, vector<32x1xf32>
    %c64 = arith.constant 64 : index
    %c0_6 = arith.constant 0 : index
    %4 = vector.load %arg3[%c64, %c0_6] : memref<128x128xf32, #tpu.memory_space<vmem>>, vector<32x32xf32>
    %c96 = arith.constant 96 : index
    %c0_7 = arith.constant 0 : index
    %5 = vector.load %arg3[%c96, %c0_7] : memref<128x128xf32, #tpu.memory_space<vmem>>, vector<32x1xf32>
    %cst = arith.constant dense<0.000000e+00> : vector<32x128xf32>
    %6 = tpu.matmul %2, %0, %cst {dimension_numbers = #tpu.dot_dimension_numbers<[1], [0], [0], [1], [0, 0, 1, 1], [], []>} : vector<32x16xf32>, vector<16x128xf32>, vector<32x128xf32> -> vector<32x128xf32>
    %7 = vector.broadcast %3 : vector<32x1xf32> to vector<32x128xf32>
    %8 = arith.addf %6, %7 : vector<32x128xf32>
    %cst_8 = arith.constant 0.000000e+00 : f32
    %9 = vector.broadcast %cst_8 : f32 to vector<32x128xf32>
    %10 = arith.maximumf %8, %9 : vector<32x128xf32>
    %cst_9 = arith.constant dense<0.000000e+00> : vector<32x128xf32>
    %11 = tpu.matmul %4, %10, %cst_9 {dimension_numbers = #tpu.dot_dimension_numbers<[1], [0], [0], [1], [0, 0, 1, 1], [], []>} : vector<32x32xf32>, vector<32x128xf32>, vector<32x128xf32> -> vector<32x128xf32>
    %12 = vector.broadcast %5 : vector<32x1xf32> to vector<32x128xf32>
    %13 = arith.addf %11, %12 : vector<32x128xf32>
    %14 = vector.extract_strided_slice %13 {offsets = [0, 0], sizes = [16, 128], strides = [1, 1]} : vector<32x128xf32> to vector<16x128xf32>
    %15 = vector.extract_strided_slice %13 {offsets = [16, 0], sizes = [16, 128], strides = [1, 1]} : vector<32x128xf32> to vector<16x128xf32>
    %cst_10 = arith.constant 0.000000e+00 : f32
    %16 = vector.broadcast %cst_10 : f32 to vector<16x128xf32>
    %17 = arith.maximumf %15, %16 : vector<16x128xf32>
    %18 = vector.broadcast %cst_10 : f32 to vector<16x128xf32>
    %19 = arith.subf %15, %18 : vector<16x128xf32>
    %20 = arith.cmpf one, %19, %19 : vector<16x128xf32>
    %21 = vector.broadcast %cst_10 : f32 to vector<16x128xf32>
    %22 = arith.addf %15, %21 : vector<16x128xf32>
    %23 = math.absf %19 : vector<16x128xf32>
    %cst_11 = arith.constant 0.000000e+00 : f32
    %24 = vector.broadcast %cst_11 : f32 to vector<16x128xf32>
    %25 = arith.subf %24, %23 : vector<16x128xf32>
    %26 = math.exp %25 : vector<16x128xf32>
    %27 = math.log1p %26 : vector<16x128xf32>
    %28 = arith.addf %17, %27 : vector<16x128xf32>
    %29 = arith.select %20, %22, %28 : vector<16x128xi1>, vector<16x128xf32>
    %30 = arith.mulf %1, %29 : vector<16x128xf32>
    %31 = arith.addf %14, %30 : vector<16x128xf32>
    %32 = tpu.reciprocal %29 : vector<16x128xf32> -> vector<16x128xf32>
    %33 = arith.subf %31, %14 : vector<16x128xf32>
    %34 = arith.mulf %33, %32 : vector<16x128xf32>
    %cst_12 = arith.constant -5.000000e-01 : f32
    %35 = vector.broadcast %cst_12 : f32 to vector<16x128xf32>
    %36 = arith.mulf %35, %34 : vector<16x128xf32>
    %37 = arith.mulf %36, %34 : vector<16x128xf32>
    %38 = math.log %29 : vector<16x128xf32>
    %39 = arith.subf %37, %38 : vector<16x128xf32>
    %cst_13 = arith.constant 0.918938517 : f32
    %40 = vector.broadcast %cst_13 : f32 to vector<16x128xf32>
    %41 = arith.subf %39, %40 : vector<16x128xf32>
    %cst_14 = arith.constant dense<0.000000e+00> : vector<128xf32>
    %42 = vector.multi_reduction <add>, %41, %cst_14 [0] : vector<16x128xf32> to vector<128xf32>
    %43 = vector.shape_cast %42 : vector<128xf32> to vector<1x128xf32>
    %c0_15 = arith.constant 0 : index
    %c0_16 = arith.constant 0 : index
    %44 = vector.load %arg4[%c0_15, %c0_16] : memref<128x128xf32, #tpu.memory_space<vmem>>, vector<32x16xf32>
    %c32_17 = arith.constant 32 : index
    %c0_18 = arith.constant 0 : index
    %45 = vector.load %arg4[%c32_17, %c0_18] : memref<128x128xf32, #tpu.memory_space<vmem>>, vector<32x1xf32>
    %c64_19 = arith.constant 64 : index
    %c0_20 = arith.constant 0 : index
    %46 = vector.load %arg4[%c64_19, %c0_20] : memref<128x128xf32, #tpu.memory_space<vmem>>, vector<32x32xf32>
    %c96_21 = arith.constant 96 : index
    %c0_22 = arith.constant 0 : index
    %47 = vector.load %arg4[%c96_21, %c0_22] : memref<128x128xf32, #tpu.memory_space<vmem>>, vector<32x1xf32>
    %cst_23 = arith.constant dense<0.000000e+00> : vector<32x128xf32>
    %48 = tpu.matmul %44, %31, %cst_23 {dimension_numbers = #tpu.dot_dimension_numbers<[1], [0], [0], [1], [0, 0, 1, 1], [], []>} : vector<32x16xf32>, vector<16x128xf32>, vector<32x128xf32> -> vector<32x128xf32>
    %49 = vector.broadcast %45 : vector<32x1xf32> to vector<32x128xf32>
    %50 = arith.addf %48, %49 : vector<32x128xf32>
    %cst_24 = arith.constant 0.000000e+00 : f32
    %51 = vector.broadcast %cst_24 : f32 to vector<32x128xf32>
    %52 = arith.maximumf %50, %51 : vector<32x128xf32>
    %cst_25 = arith.constant dense<0.000000e+00> : vector<32x128xf32>
    %53 = tpu.matmul %46, %52, %cst_25 {dimension_numbers = #tpu.dot_dimension_numbers<[1], [0], [0], [1], [0, 0, 1, 1], [], []>} : vector<32x32xf32>, vector<32x128xf32>, vector<32x128xf32> -> vector<32x128xf32>
    %54 = vector.broadcast %47 : vector<32x1xf32> to vector<32x128xf32>
    %55 = arith.addf %53, %54 : vector<32x128xf32>
    %56 = vector.extract_strided_slice %55 {offsets = [0, 0], sizes = [16, 128], strides = [1, 1]} : vector<32x128xf32> to vector<16x128xf32>
    %57 = vector.extract_strided_slice %55 {offsets = [16, 0], sizes = [16, 128], strides = [1, 1]} : vector<32x128xf32> to vector<16x128xf32>
    %cst_26 = arith.constant 0.000000e+00 : f32
    %58 = vector.broadcast %cst_26 : f32 to vector<16x128xf32>
    %59 = arith.maximumf %57, %58 : vector<16x128xf32>
    %60 = vector.broadcast %cst_26 : f32 to vector<16x128xf32>
    %61 = arith.subf %57, %60 : vector<16x128xf32>
    %62 = arith.cmpf one, %61, %61 : vector<16x128xf32>
    %63 = vector.broadcast %cst_26 : f32 to vector<16x128xf32>
    %64 = arith.addf %57, %63 : vector<16x128xf32>
    %65 = math.absf %61 : vector<16x128xf32>
    %cst_27 = arith.constant 0.000000e+00 : f32
    %66 = vector.broadcast %cst_27 : f32 to vector<16x128xf32>
    %67 = arith.subf %66, %65 : vector<16x128xf32>
    %68 = math.exp %67 : vector<16x128xf32>
    %69 = math.log1p %68 : vector<16x128xf32>
    %70 = arith.addf %59, %69 : vector<16x128xf32>
    %71 = arith.select %62, %64, %70 : vector<16x128xi1>, vector<16x128xf32>
    %72 = tpu.reciprocal %71 : vector<16x128xf32> -> vector<16x128xf32>
    %73 = arith.subf %0, %56 : vector<16x128xf32>
    %74 = arith.mulf %73, %72 : vector<16x128xf32>
    %cst_28 = arith.constant -5.000000e-01 : f32
    %75 = vector.broadcast %cst_28 : f32 to vector<16x128xf32>
    %76 = arith.mulf %75, %74 : vector<16x128xf32>
    %77 = arith.mulf %76, %74 : vector<16x128xf32>
    %78 = math.log %71 : vector<16x128xf32>
    %79 = arith.subf %77, %78 : vector<16x128xf32>
    %cst_29 = arith.constant 0.918938517 : f32
    %80 = vector.broadcast %cst_29 : f32 to vector<16x128xf32>
    %81 = arith.subf %79, %80 : vector<16x128xf32>
    %cst_30 = arith.constant dense<0.000000e+00> : vector<128xf32>
    %82 = vector.multi_reduction <add>, %81, %cst_30 [0] : vector<16x128xf32> to vector<128xf32>
    %83 = vector.shape_cast %82 : vector<128xf32> to vector<1x128xf32>
    %c0_31 = arith.constant 0 : index
    %c0_32 = arith.constant 0 : index
    %84 = vector.load %arg5[%c0_31, %c0_32] : memref<16x128xf32, #tpu.memory_space<vmem>>, vector<16x128xf32>
    tpu.vector_store %arg5[%c0_31, %c0_32], %31 {strides = array<i32>} : memref<16x128xf32, #tpu.memory_space<vmem>>, vector<16x128xf32>,
    %85 = arith.subf %43, %83 : vector<1x128xf32>
    %c0_33 = arith.constant 0 : index
    %c0_34 = arith.constant 0 : index
    %86 = vector.load %arg6[%c0_33, %c0_34] : memref<1x128xf32, #tpu.memory_space<vmem>>, vector<1x128xf32>
    tpu.vector_store %arg6[%c0_33, %c0_34], %85 {strides = array<i32>} : memref<1x128xf32, #tpu.memory_space<vmem>>, vector<1x128xf32>,
    return
  }
  func.func @transform_0(%arg0: i32) -> (i32, i32) {
    %c0_i32 = arith.constant 0 : i32
    %c0_i32_0 = arith.constant 0 : i32
    return %c0_i32, %arg0 : i32, i32
  }
  func.func @transform_1(%arg0: i32) -> (i32, i32) {
    %c0_i32 = arith.constant 0 : i32
    %c0_i32_0 = arith.constant 0 : i32
    return %c0_i32, %arg0 : i32, i32
  }
  func.func @transform_2(%arg0: i32) -> (i32, i32) {
    %c0_i32 = arith.constant 0 : i32
    %c0_i32_0 = arith.constant 0 : i32
    %c0_i32_1 = arith.constant 0 : i32
    return %c0_i32, %c0_i32_0 : i32, i32
  }
  func.func @transform_3(%arg0: i32) -> (i32, i32) {
    %c0_i32 = arith.constant 0 : i32
    %c0_i32_0 = arith.constant 0 : i32
    %c0_i32_1 = arith.constant 0 : i32
    return %c0_i32, %c0_i32_0 : i32, i32
  }
  func.func @transform_4(%arg0: i32) -> (i32, i32) {
    %c0_i32 = arith.constant 0 : i32
    %c0_i32_0 = arith.constant 0 : i32
    return %c0_i32, %arg0 : i32, i32
  }
  func.func @transform_5(%arg0: i32) -> (i32, i32) {
    %c0_i32 = arith.constant 0 : i32
    %c0_i32_0 = arith.constant 0 : i32
    return %c0_i32, %arg0 : i32, i32
  }
}

</mosaic_0001>

<bundles_post_ra>
// kernel: tpu_custom_call.1
= control target key start
LH: loop header
LB: loop body
LE: loop exit
PB: predicated region body
PF: predicated region fallthrough
CT: control target
= control target key end

     0   :  { %s2028_s0 = inlined_call_operand.hbm [shape: f32[16,256], index: 0, kind: input, shape index: {}]   ;;  %s2029_s1 = inlined_call_operand.hbm [shape: f32[16,256], index: 1, kind: input, shape index: {}]   ;;  %s2030_s2 = inlined_call_operand.hbm [shape: f32[128,128], index: 2, kind: input, shape index: {}]   ;;  %s2031_s3 = inlined_call_operand.hbm [shape: f32[128,128], index: 3, kind: input, shape index: {}]   ;;  %s2032_s4 = inlined_call_operand.hbm [shape: f32[16,256], index: 4, kind: output, shape index: {0}]   ;;  %s2033_s5 = inlined_call_operand.hbm [shape: f32[1,256], index: 5, kind: output, shape index: {1}]  }
   0x1   :  { %2042 = sst [smem:[#allocation19_spill]] %s2028_s0 }
   0x2   :  { %2043 = sst [smem:[#allocation20_spill]] %s2030_s2 }
   0x3   :  { %2044 = sst [smem:[#allocation21_spill]] %s2031_s3 }
   0x4   :  { %11 = vsyncpa [#allocation3], 0 }
   0x5   :  { %13 = vsyncpa [#allocation3 + $0x1], 0 }
   0x6   :  { %14 = vsyncpa [#allocation6], 0 }
   0x7   :  { %16 = vsyncpa [#allocation6 + $0x1], 0 }
   0x8   :  { %17 = vsyncpa [#allocation9], 0 }
   0x9   :  { %18 = vsyncpa [#allocation4], 0 }
   0xa   :  { %20 = vsyncpa [#allocation4 + $0x1], 0 }
   0xb   :  { %21 = vsyncpa [#allocation12], 0 }
   0xc   :  { %23 = vsyncpa [#allocation12 + $0x1], 0  ;;  %s1666_s18 = smov 0   ;;  %s1668_s19 = smov 0  }
   0xd   :  { %s1670_s20 = smov 0   ;;  %s1672_s21 = smov 0  }
   0xe LB: > { %s1687_s22 = sadd.s32 4294967295, %s1621_s21   ;;  %s1137_s23 = sadd.s32 4294967294, %s1621_s21   ;;  %s1621_s21 = sphi %s1672_s21, %s2072_s21   ;;  %s1617_s20 = sphi %s1670_s20, %s2071_s20   ;;  %s1613_s19 = sphi %s1668_s19, %s2070_s19   ;;  %s1609_s18 = sphi %s1666_s18, %s2069_s18  }
   0xf   : > { %s1691_s24 = sadd.s32 1, %s1621_s21   ;;  %s36_s25 = sadd.s32 1, %s1617_s20 }
  0x10   : > { %s33_s26 = ssub.s32 %s1621_s21, %s1691_s24  ;;  %p43_p0 = scmp.ne.s32.totalorder %s1617_s20, %s1613_s19 }
  0x11   : > { %p34_p1 = scmp.eq.s32.totalorder %s33_s26, 0  ;;  %p44_p2 = scmp.eq.s32.totalorder %s1621_s21, 0 }
  0x12   : > { %p49_p3 = scmp.ne.s32.totalorder %s1613_s19, %s1609_s18  ;;  %p2034_p4 = scmp.eq.s32.totalorder %s1687_s22, 0 }
  0x13   : > { %s1703_s27 = scalar_select %p34_p1, %s1617_s20, %s36_s25  }
  0x14   : > { %p1705_p5 = por %p44_p2, %p43_p0  ;;  %p1711_p6 = por %p2034_p4, %p49_p3 }
  0x15   : > { %p141_p7 = scmp.eq.s32.totalorder %s1687_s22, 1  ;;  %p147_p8 = scmp.eq.s32.totalorder %s1137_s23, 1 }
  0x16   : > { %s2045_s28 = scalar_select %p1705_p5, 1, 0 }
  0x17   : > { %s2046_s29 = scalar_select %p1711_p6, 1, 0 }
  0x18   : > { %p1138_p9 = scmp.ge.s32.totalorder %s1621_s21, 1  ;;  %p180_p10 = scmp.lt.s32.totalorder %s1621_s21, 3 }
  0x19   : > { %p1718_p11 = por %p141_p7, %p43_p0  ;;  %p1722_p12 = por %p147_p8, %p49_p3 }
  0x1a   : > { %p1726_p13 = pnand %p1138_p9, %p180_p10  ;;  %s1623_s8 = smov [#allocation7]  }
  0x1b   : > { %s2047_s30 = scalar_select %p1718_p11, 1, 0 }
  0x1c   : > { %s2048_s6 = scalar_select %p1722_p12, 1, 0 }
  0x1d   : > { %s2049_s7 = scalar_select %p1726_p13, 1, 0 }
  0x1e   : > { %p1293_p1 = pneg %p1726_p13  ;;  %s192_s9 = sshll.u32 %s1623_s8, 4  ;;  %s193_s9 = int_to_ptr.vmem [resolvable:$true] %s192_s9 }
  0x1f   : > { %s1624_s11 = smov [#allocation8]   ;;  %s2051_s2 = sld [smem:[#allocation20_spill]] }
  0x20   : > { %p1734_p2 = pnand %p1293_p1, %p2034_p4  ;;  %s205_s12 = sshll.u32 %s1624_s11, 4  ;;  %s206_s12 = int_to_ptr.vmem [resolvable:$true] %s205_s12 }
  0x22   : > { %p1397_p8 = pneg %p1734_p2 }
  0x25   : > { %s1395_s15 = scalar_lea.hbm %s2051_s2, 2048 }
  0x26   : > { %p1396_p7 = scmp.ne.s32.totalorder %s2051_s2, %s1395_s15  ;;  %p1402_p1 = scmp.lt.u32.totalorder %s1395_s15, %s2051_s2 }
  0x28   : > { %p1398_p9 = pnand %p1397_p8, %p1396_p7 }
  0x2a   : > { %p1399_p10 = pneg %p1398_p9 }
  0x2c   : > { %p1404_p0 = pnand %p1402_p1, %p1399_p10 }
  0x2e   : > { %1407 = shalt.err (!%p1404_p0)
}
  0x2f   : > { %s1408_s26 = scalar_lea.vmem %s193_s9, 2048  ;;  %p1416_p11 = scmp.lt.s32.totalorder %s193_s9, %s193_s9 }
  0x30   : > { %p1409_p4 = scmp.ne.s32.totalorder %s193_s9, %s1408_s26  ;;  %p1417_p6 = scmp.lt.s32.totalorder %s1408_s26, %s1408_s26 }
  0x32   : > { %p1411_p3 = pnand %p1409_p4, %p1397_p8  ;;  %p1418_p13 = por %p1417_p6, %p1416_p11 }
  0x34   : > { %p1412_p12 = pneg %p1411_p3 }
  0x36   : > { %p1419_p5 = pnand %p1418_p13, %p1412_p12 }
  0x38   : > { %1422 = shalt.err (!%p1419_p5)
}
  0x39   : > { %s2040_s8 = smov 128   ;;  %s1626_s11 = smov 8  }
  0x3a   : > { %1296 = dma.hbm_to_vmem [thread:$0]  (!%p1734_p2), %s2051_s2, 2048, %s193_s9, [#allocation6], %s2040_s8, %s2040_s8, %s1626_s11  }
  0x3b   : > { %p2052_p4 = scmp.ne.s32.totalorder %s2045_s28, 0  ;;  %p2053_p0 = scmp.lt.s32.totalorder %s1621_s21, 2 }
  0x3c   : > { %s2055_s3 = sld [smem:[#allocation21_spill]] }
  0x3d   : > { %p1769_p3 = pnand %p2053_p0, %p2052_p4 }
  0x3f   : > { %s2054_s15 = scalar_select %p1769_p3, 1, 0 }
  0x42   : > { %s1423_s23 = scalar_lea.hbm %s2055_s3, 2048 }
  0x43   : > { %p1424_p5 = scmp.ne.s32.totalorder %s2055_s3, %s1423_s23  ;;  %p1430_p12 = scmp.lt.u32.totalorder %s1423_s23, %s2055_s3 }
  0x45   : > { %p1426_p6 = pnand %p1424_p5, %p1397_p8 }
  0x47   : > { %p1427_p11 = pneg %p1426_p6 }
  0x49   : > { %p1432_p13 = pnand %p1430_p12, %p1427_p11 }
  0x4b   : > { %1435 = shalt.err (!%p1432_p13)
}
  0x4c   : > { %s1436_s13 = scalar_lea.vmem %s206_s12, 2048  ;;  %p1444_p1 = scmp.lt.s32.totalorder %s206_s12, %s206_s12 }
  0x4d   : > { %p1437_p7 = scmp.ne.s32.totalorder %s206_s12, %s1436_s13  ;;  %p1445_p4 = scmp.lt.s32.totalorder %s1436_s13, %s1436_s13 }
  0x4f   : > { %p1439_p9 = pnand %p1437_p7, %p1397_p8  ;;  %p1446_p0 = por %p1445_p4, %p1444_p1 }
  0x51   : > { %p1440_p10 = pneg %p1439_p9 }
  0x53   : > { %p1447_p3 = pnand %p1446_p0, %p1440_p10 }
  0x55   : > { %1450 = shalt.err (!%p1447_p3)
}
  0x56   : > { %1299 = dma.hbm_to_vmem [thread:$0]  (!%p1734_p2), %s2055_s3, 2048, %s206_s12, [#allocation9], %s2040_s8, %s2040_s8, %s1626_s11  }
  0x57   : > { %s219_s17 = sand.u32 1, %s1617_s20   ;;  %s2039_s25 = sshll.u32 %s1621_s21, 7 }
  0x58   : > { %s1797_s23 = sshll.u32 %s219_s17, 4  ;;  %s2056_s0 = sld [smem:[#allocation19_spill]] }
  0x59   : > { %s223_s28 = scalar_lea.vmem [#allocation2], %s1797_s23  ;;  %s1810_s12 = scalar_lea.sflag [#allocation3], %s219_s17 }
  0x5a   : > { %s229_s13 = sshll.u32 %s223_s28, 4  ;;  %p2057_p8 = scmp.ne.s32.totalorder %s2054_s15, 0  ;;  %s1808_s13 = int_to_ptr.vmem [resolvable:$true] %s229_s13 }
  0x5c   : > { %p1453_p3 = pneg %p2057_p8 }
  0x5e   : > { %s1805_s9 = scalar_lea.hbm %s2056_s0, %s2039_s25  ;;  %s1456_s10 = scalar_lea.hbm %s2056_s0, 512 }
  0x5f   : > { %s1451_s14 = scalar_lea.hbm %s1805_s9, 256  ;;  %p1457_p11 = scmp.lt.u32.totalorder %s1805_s9, %s2056_s0 }
  0x60   : > { %p1452_p2 = scmp.ne.s32.totalorder %s1805_s9, %s1451_s14  ;;  %p1458_p12 = scmp.lt.u32.totalorder %s1456_s10, %s1451_s14 }
  0x61   : > { %p1460_p7 = scmp.lt.u32.totalorder %s1451_s14, %s1805_s9 }
  0x62   : > { %p1454_p5 = pnand %p1453_p3, %p1452_p2  ;;  %p1459_p13 = por %p1458_p12, %p1457_p11 }
  0x64   : > { %p1455_p6 = pneg %p1454_p5  ;;  %p1461_p9 = por %p1460_p7, %p1459_p13 }
  0x66   : > { %p1462_p10 = pnand %p1461_p9, %p1455_p6 }
  0x68   : > { %1465 = shalt.err (!%p1462_p10)
}
  0x69   : > { %s1466_s17 = scalar_lea.vmem %s1808_s13, 256  ;;  %s1627_s28 = smov [#allocation2]  }
  0x6a   : > { %p1467_p1 = scmp.ne.s32.totalorder %s1808_s13, %s1466_s17  ;;  %s1471_s16 = sshll.u32 %s1627_s28, 4  ;;  %s1472_s16 = int_to_ptr.vmem [resolvable:$false] %s1471_s16 }
  0x6b   : > { %s1473_s8 = scalar_lea.vmem %s1472_s16, 512  ;;  %p1474_p2 = scmp.lt.s32.totalorder %s1808_s13, %s1472_s16 }
  0x6c   : > { %p1469_p4 = pnand %p1467_p1, %p1453_p3  ;;  %p1475_p5 = scmp.lt.s32.totalorder %s1473_s8, %s1466_s17 }
  0x6e   : > { %p1470_p0 = pneg %p1469_p4  ;;  %p1476_p11 = por %p1475_p5, %p1474_p2 }
  0x70   : > { %p1477_p12 = pnand %p1476_p11, %p1470_p0 }
  0x72   : > { %1480 = shalt.err (!%p1477_p12)
}
  0x73   : > { %s1628_s25 = smov 256   ;;  %s2058_s14 = smov 128  }
  0x74   : > { %1303 = dma.hbm_to_vmem [thread:$0]  (!%p2057_p8), %s1805_s9, 256, %s1808_s13, %s1810_s12, %s1628_s25, %s2058_s14, %s1626_s11  }
  0x75   : > { %s2059_s26 = sshll.u32 %s1621_s21, 7  ;;  %s243_s16 = scalar_lea.vmem [#allocation5], %s1797_s23 }
  0x76   : > { %s1846_s28 = scalar_lea.hbm %s2029_s1, %s2059_s26  ;;  %s249_s8 = sshll.u32 %s243_s16, 4  ;;  %s1850_s8 = int_to_ptr.vmem [resolvable:$true] %s249_s8 }
  0x77   : > { %s239_s0 = sand.u32 1, %s1621_s21   ;;  %s1481_s3 = scalar_lea.hbm %s1846_s28, 256 }
  0x78   : > { %s1852_s2 = scalar_lea.sflag [#allocation6], %s239_s0  ;;  %p1482_p6 = scmp.ne.s32.totalorder %s1846_s28, %s1481_s3 }
  0x79   : > { %s1486_s12 = scalar_lea.hbm %s2029_s1, 512  ;;  %p1487_p9 = scmp.lt.u32.totalorder %s1846_s28, %s2029_s1 }
  0x7a   : > { %p1484_p13 = pnand %p1482_p6, %p1453_p3  ;;  %p1488_p10 = scmp.lt.u32.totalorder %s1486_s12, %s1481_s3 }
  0x7b   : > { %p1490_p4 = scmp.lt.u32.totalorder %s1481_s3, %s1846_s28 }
  0x7c   : > { %p1485_p7 = pneg %p1484_p13  ;;  %p1489_p1 = por %p1488_p10, %p1487_p9 }
  0x7e   : > { %p1491_p0 = por %p1490_p4, %p1489_p1 }
  0x80   : > { %p1492_p2 = pnand %p1491_p0, %p1485_p7 }
  0x82   : > { %1495 = shalt.err (!%p1492_p2)
}
  0x83   : > { %s1496_s0 = scalar_lea.vmem %s1850_s8, 256  ;;  %s1629_s23 = smov [#allocation5]  }
  0x84   : > { %p1497_p5 = scmp.ne.s32.totalorder %s1850_s8, %s1496_s0  ;;  %s1501_s17 = sshll.u32 %s1629_s23, 4  ;;  %s1502_s17 = int_to_ptr.vmem [resolvable:$false] %s1501_s17 }
  0x85   : > { %s1503_s16 = scalar_lea.vmem %s1502_s17, 512  ;;  %p1504_p6 = scmp.lt.s32.totalorder %s1850_s8, %s1502_s17 }
  0x86   : > { %p1499_p11 = pnand %p1497_p5, %p1453_p3  ;;  %p1505_p13 = scmp.lt.s32.totalorder %s1503_s16, %s1496_s0 }
  0x88   : > { %p1500_p12 = pneg %p1499_p11  ;;  %p1506_p9 = por %p1505_p13, %p1504_p6 }
  0x8a   : > { %p1507_p10 = pnand %p1506_p9, %p1500_p12 }
  0x8c   : > { %1510 = shalt.err (!%p1507_p10)
}
  0x8d   : > { %1306 = dma.hbm_to_vmem [thread:$0]  (!%p2057_p8), %s1846_s28, 256, %s1850_s8, %s1852_s2, %s1628_s25, %s2058_s14, %s1626_s11  }
  0x8e   : > { %p2060_p3 = scmp.ne.s32.totalorder %s2049_s7, 0 }
  0x8f   : > { %s1884_s3 = sand.u32 (!%p2060_p3), 1, %s1613_s19   ;;  %p2061_p7 = scmp.ne.s32.totalorder (!%p2060_p3), %s2046_s29, 0 }
  0x90   : > { %261 = sbr.rel (%p2060_p3) target bundleno = 1195 (0x4ab), region = 36  ;;  %s1887_s9 = sshll.u32 (!%p2060_p3), %s1884_s3, 4 }
  0x91   : > { %s264_s15 = scalar_lea.sflag (!%p2060_p3), [#allocation3], %s1884_s3  ;;  %s267_s13 = scalar_lea.vmem (!%p2060_p3), [#allocation2], %s1887_s9 }
  0x97   : > { %1584 = dma.done.wait (%p2061_p7), %s264_s15, 256  }
  0x98   : > { %1586 = vsyncadd (%p2061_p7), %s264_s15, 4294967040  ;;  %s272_s2 = sand.u32 1, %s1687_s22   ;;  %s276_s11 = scalar_lea.vmem [#allocation5], %s1887_s9 }
  0x99   : > { %s273_s7 = scalar_lea.sflag [#allocation6], %s272_s2 }
  0x9a   : > { %1588 = dma.done.wait (%p2061_p7), %s273_s7, 256  }
  0x9b   : > { %1590 = vsyncadd (%p2061_p7), %s273_s7, 4294967040  ;;  %p2062_p8 = scmp.eq.s32.totalorder %s1687_s22, 0 }
  0x9d   : > { %1592 = dma.done.wait (%p2062_p8), [#allocation6], 2048   ;;  %p2063_p1 = pmov %p2062_p8 }
  0x9f   : > { %1594 = vsyncadd (%p2063_p1), [#allocation6], 4294965248  ;;  %p2064_p4 = pmov %p2063_p1 }
  0xa0   : > { %p2065_p0 = pmov %p2063_p1 }
  0xa1   : > { %1596 = dma.done.wait (%p2064_p4), [#allocation9], 2048  }
  0xa2   : > { %1598 = vsyncadd (%p2065_p0), [#allocation9], 4294965248  ;;  %v1630_v0 = vmov 0   ;;  %vm360_vm0 = vcmask 130048   ;;  %v1909_v1 = vld [vmem:[%s267_s13] sm:$0xff]  ;;  %v1911_v2 = vld [vmem:[%s267_s13 + $0x8] sm:$0xff] }
  0xa3   : > { %1361 = vset.pattern.permute.xlu0 %v1630_v0  ;;  %1362 = vset.pattern.permute.xlu1 %v1630_v0  ;;  %v324_v3 = vld [vmem:[#allocation7] sm:$0xff]  ;;  %v1253_v4 = vpack.c.bf16 %v1911_v2, %v1909_v1  ;;  %v330_v6 = vld [vmem:[#allocation7 + $0x30] sm:$0xff]  ;;  %v325_v7 = vld [vmem:[#allocation7 + $0x8] sm:$0xff]  ;;  %vm482_vm1 = vcmask 261120   ;;  %s1929_s29 = scalar_lea.vmem [#allocation10], %s1887_s9  ;;  %s1173_s14 = sshll.u32 %s1687_s22, 7 }
  0xa4   : > { %1209 = vmatprep.mubr.msk.f32.mxu0 %vm360_vm0, %v324_v3  ;;  %v328_v5 = vld [vmem:[#allocation7 + $0x20] sm:$0xff]  ;;  %352 = vperm.xlu1 %1362, %v330_v6   ;;  %v329_v8 = vld [vmem:[#allocation7 + $0x28] sm:$0xff]  ;;  %v326_v9 = vld [vmem:[#allocation7 + $0x10] sm:$0xff]  ;;  %s981_s25 = sshll.u32 %s1929_s29, 4  ;;  %s1949_s12 = scalar_lea.hbm %s2032_s4, %s1173_s14  ;;  %s1943_s25 = int_to_ptr.vmem [resolvable:$true] %s981_s25 }
  0xa5   : > { %1254 = vmatprep.subr.bf16.mxu0 %v1253_v4  ;;  %342 = vperm.xlu0 %1361, %v328_v5   ;;  %v331_v10 = vld [vmem:[#allocation7 + $0x38] sm:$0xff]  ;;  %v338_v12 = vld [vmem:[#allocation7 + $0x70] sm:$0xff]  ;;  %v336_v14 = vld [vmem:[#allocation7 + $0x60] sm:$0xff]  ;;  %s965_s26 = scalar_lea.sflag [#allocation4], %s1884_s3  ;;  %s1511_s10 = scalar_lea.vmem %s1943_s25, 256 }
  0xa6   : > { %1256 = vmatpush3.bf16.msra.mxu0 %v1253_v4  ;;  %v327_v11 = vld [vmem:[#allocation7 + $0x18] sm:$0xff]  ;;  %v337_v15 = vld [vmem:[#allocation7 + $0x68] sm:$0xff]  ;;  %v649_v16 = vld [vmem:[#allocation8 + $0x20] sm:$0xff]  ;;  %p1512_p2 = scmp.ne.s32.totalorder %s1943_s25, %s1511_s10  ;;  %p2066_p5 = scmp.ne.s32.totalorder %s2047_s30, 0 }
  0xa7   : > { %v339_v13 = vld [vmem:[#allocation7 + $0x78] sm:$0xff]  ;;  %v650_v17 = vld [vmem:[#allocation8 + $0x28] sm:$0xff]  ;;  %v651_v18 = vld [vmem:[#allocation8 + $0x30] sm:$0xff]  ;;  %s1631_s0 = smov [#allocation10]  }
  0xa8   : > { %357 = vperm.xlu1 %1362, %v331_v10   ;;  %v652_v19 = vld [vmem:[#allocation8 + $0x38] sm:$0xff]  ;;  %v659_v20 = vld [vmem:[#allocation8 + $0x70] sm:$0xff]  ;;  %v657_v22 = vld [vmem:[#allocation8 + $0x60] sm:$0xff]  ;;  %p1513_p11 = pnand %p1512_p2, %p2066_p5  ;;  %s1515_s23 = sshll.u32 %s1631_s0, 4  ;;  %s1516_s23 = int_to_ptr.vmem [resolvable:$false] %s1515_s23 }
  0xa9   : > { %1210 = vmatmul.mubr.msk.f32.vlgmr.msra.gmra.mrb[0].mxu0 %vm360_vm0, %v325_v7  ;;  %347 = vperm.xlu0 %1361, %v329_v8   ;;  %v660_v21 = vld [vmem:[#allocation8 + $0x78] sm:$0xff]  ;;  %v658_v23 = vld [vmem:[#allocation8 + $0x68] sm:$0xff]  ;;  %v332_v24 = vld [vmem:[#allocation7 + $0x40] sm:$0xff]  ;;  %s1517_s17 = scalar_lea.vmem %s1516_s23, 512  ;;  %p1518_p6 = scmp.lt.s32.totalorder %s1943_s25, %s1516_s23 }
  0xaa   : > { %1212 = vmatprep.mubr.msk.f32.mxu0 %vm360_vm0, %v326_v9  ;;  %1223 = vmatprep.mubr.msk.f32.mxu1 %vm482_vm1, %v332_v24  ;;  %v333_v43 = vld [vmem:[#allocation7 + $0x48] sm:$0xff]  ;;  %v334_v44 = vld [vmem:[#allocation7 + $0x50] sm:$0xff]  ;;  %v335_v45 = vld [vmem:[#allocation7 + $0x58] sm:$0xff]  ;;  %p1514_p12 = pneg %p1513_p11  ;;  %p1519_p13 = scmp.lt.s32.totalorder %s1517_s17, %s1511_s10 }
  0xab   : > { %v645_v46 = vld [vmem:[#allocation8] sm:$0xff] }
  0xac   : > { %479 = vperm.xlu1 %1362, %v339_v13   ;;  %p1520_p9 = por %p1519_p13, %p1518_p6 }
  0xad   : > { %1213 = vmatmul.mubr.msk.f32.gmra.mrb[2].mxu0 %vm360_vm0, %v327_v11  ;;  %474 = vperm.xlu0 %1361, %v338_v12  }
  0xae   : > { %1233 = vmatprep.mubr.msk.f32.mxu0 %vm360_vm0, %v645_v46  ;;  %p1521_p10 = pnand %p1520_p9, %p1514_p12 }
  0xb0   : > { %469 = vperm.xlu1 %1362, %v337_v15  }
  0xb1   : > { %464 = vperm.xlu0 %1361, %v336_v14  }
  0xb4   : > { %668 = vperm.xlu1 %1362, %v650_v17  }
  0xb5   : > { %663 = vperm.xlu0 %1361, %v649_v16  }
  0xb8   : > { %678 = vperm.xlu1 %1362, %v652_v19  }
  0xb9   : > { %673 = vperm.xlu0 %1361, %v651_v18  }
  0xbc   : > { %799 = vperm.xlu1 %1362, %v660_v21  }
  0xbd   : > { %794 = vperm.xlu0 %1361, %v659_v20   ;;  %v323_v20 = vld [vmem:[%s276_s11 + $0x8] sm:$0xff] }
  0xc0   : > { %789 = vperm.xlu1 %1362, %v658_v23  }
  0xc1   : > { %784 = vperm.xlu0 %1361, %v657_v22   ;;  %v322_v22 = vld [vmem:[%s276_s11] sm:$0xff] }
 0x123   : > { %v353_v26 = vpop.permute.xlu1 %352 }
 0x124   : > { %v343_v25 = vpop.permute.xlu0 %342 }
 0x127   : > { %v358_v33 = vpop.permute.xlu1 %357 }
 0x128   : > { %v348_v27 = vpop.permute.xlu0 %347 }
 0x12b   : > { %v480_v49 = vpop.permute.xlu1 %479 }
 0x12c   : > { %v475_v51 = vpop.permute.xlu0 %474 }
 0x12f   : > { %v470_v23 = vpop.permute.xlu1 %469 }
 0x17c   : > { %v1211_v28 = vpop.f32.mrb[0].mxu0 }
 0x17d   : > { %v445_v29 = vadd.f32 %v1211_v28, %v348_v27  ;;  %v439_v30 = vpop.f32.mrb[1].mxu0 }
 0x17e   : > { %v440_v31 = vadd.f32 %v439_v30, %v343_v25  ;;  %v465_v25 = vpop.permute.xlu0 %464 }
 0x17f   : > { %v459_v32 = vmax.f32 %v445_v29, 0.0 }
 0x180   : > { %v458_v34 = vmax.f32 %v440_v31, 0.0  ;;  %v1214_v35 = vpop.f32.mrb[2].mxu0 }
 0x181   : > { %v455_v36 = vadd.f32 %v1214_v35, %v358_v33  ;;  %v449_v37 = vpop.f32.mrb[3].mxu0 }
 0x182   : > { %v450_v38 = vadd.f32 %v449_v37, %v353_v26  ;;  %v1257_v39 = vpack.c.bf16 %v459_v32, %v458_v34  ;;  %v647_v37 = vld [vmem:[#allocation8 + $0x10] sm:$0xff] }
 0x183   : > { %v461_v40 = vmax.f32 %v455_v36, 0.0  ;;  %v646_v36 = vld [vmem:[#allocation8 + $0x8] sm:$0xff] }
 0x184   : > { %v460_v41 = vmax.f32 %v450_v38, 0.0  ;;  %1258 = vmatprep.subr.bf16.mxu1 %v1257_v39 }
 0x185   : > { %1260 = vmatpush3.bf16.msra.mxu1 %v1257_v39 }
 0x186   : > { %v1261_v42 = vpack.c.bf16 %v461_v40, %v460_v41 }
 0x188   : > { %1262 = vmatprep.subr.bf16.mxu1 %v1261_v42 }
 0x189   : > { %1264 = vmatpush3.bf16.msra.mxu1 %v1261_v42  ;;  %v648_v42 = vld [vmem:[#allocation8 + $0x18] sm:$0xff] }
 0x18c   : > { %1224 = vmatmul.mubr.msk.f32.vlgmr.msra.gmra.mrb[0].mxu1 %vm482_vm1, %v333_v43 }
 0x18d   : > { %1226 = vmatprep.mubr.msk.f32.mxu1 %vm482_vm1, %v334_v44 }
 0x190   : > { %1227 = vmatmul.mubr.msk.f32.gmra.mrb[2].mxu1 %vm482_vm1, %v335_v45 }
 0x25f   : > { %v1225_v47 = vpop.f32.mrb[0].mxu1 }
 0x260   : > { %v561_v48 = vpop.f32.mrb[1].mxu1  ;;  %v567_v26 = vadd.f32 %v1225_v47, %v470_v23 }
 0x261   : > { %v562_v29 = vadd.f32 %v561_v48, %v465_v25 }
 0x263   : > { %v1228_v50 = vpop.f32.mrb[2].mxu1 }
 0x264   : > { %v577_v52 = vadd.f32 %v1228_v50, %v480_v49  ;;  %v571_v53 = vpop.f32.mrb[3].mxu1 }
 0x265   : > { %v572_v54 = vadd.f32 %v571_v53, %v475_v51 }
 0x266   : > { %v587_v55 = vand.u32 2147483647, %v577_v52  ;;  %v581_v13 = vmax.f32 %v577_v52, 0.0  ;;  %vm583_vm4 = vcmp.ne.f32.partialorder %v577_v52, %v577_v52 }
 0x267   : > { %v586_v56 = vand.u32 2147483647, %v572_v54  ;;  %v580_v17 = vmax.f32 %v572_v54, 0.0  ;;  %vm582_vm5 = vcmp.ne.f32.partialorder %v572_v54, %v572_v54 }
 0x268   : > { %v589_v57 = vsub.f32 0.0, %v587_v55 }
 0x269   : > { %v588_v58 = vsub.f32 0.0, %v586_v56  ;;  %v653_v56 = vld [vmem:[#allocation8 + $0x40] sm:$0xff] }
 0x26a   : > { %v592_v59 = vmul.f32 1.442695, %v589_v57  ;;  %1247 = vmatprep.mubr.msk.f32.mxu1 %vm482_vm1, %v653_v56  ;;  %v669_v57 = vpop.permute.xlu1 %668 }
 0x26b   : > { %v590_v60 = vmul.f32 1.442695, %v588_v58  ;;  %v664_v58 = vpop.permute.xlu0 %663 }
 0x26c   : > { %1363 = vpow2.f32 %v592_v59 }
 0x26d   : > { %1365 = vpow2.f32 %v590_v60 }
 0x276   : > { %v1364_v61 = vpop.eup %1363 }
 0x277   : > { %v1366_v62 = vpop.eup %1365  ;;  %v603_v63 = vadd.f32 1.0, %v1364_v61  ;;  %v606_v3 = vmul.f32 -0.5, %v1364_v61  ;;  %v609_v6 = vand.u32 2147483647, %v1364_v61 }
 0x278   : > { %v594_v0 = vadd.f32 1.0, %v1366_v62  ;;  %v597_v4 = vmul.f32 -0.5, %v1366_v62  ;;  %v600_v8 = vand.u32 2147483647, %v1366_v62 }
 0x279   : > { %1367 = vlog2.f32 %v603_v63  ;;  %v607_v5 = vadd.f32 1.0, %v606_v3  ;;  %vm610_vm2 = vcmp.lt.f32.partialorder %v609_v6, 0.0004427343 }
 0x27a   : > { %1369 = vlog2.f32 %v594_v0  ;;  %v598_v7 = vadd.f32 1.0, %v597_v4  ;;  %vm601_vm3 = vcmp.lt.f32.partialorder %v600_v8, 0.0004427343  ;;  %v679_v0 = vpop.permute.xlu1 %678 }
 0x27b   : > { %v608_v12 = vmul.f32 %v1364_v61, %v607_v5  ;;  %v674_v5 = vpop.permute.xlu0 %673 }
 0x27c   : > { %v599_v15 = vmul.f32 %v1366_v62, %v598_v7 }
 0x283   : > { %v1368_v9 = vpop.eup %1367 }
 0x284   : > { %v1370_v10 = vpop.eup %1369  ;;  %v605_v11 = vmul.f32 0.6931472, %v1368_v9 }
 0x285   : > { %v596_v14 = vmul.f32 0.6931472, %v1370_v10 }
 0x286   : > { %v611_v16 = vsel %vm610_vm2, %v608_v12, %v605_v11 }
 0x287   : > { %v613_v18 = vadd.f32 %v611_v16, %v581_v13  ;;  %v602_v19 = vsel %vm601_vm3, %v599_v15, %v596_v14  ;;  %v654_v13 = vld [vmem:[#allocation8 + $0x48] sm:$0xff]  ;;  %v655_v14 = vld [vmem:[#allocation8 + $0x50] sm:$0xff]  ;;  %v656_v15 = vld [vmem:[#allocation8 + $0x58] sm:$0xff] }
 0x288   : > { %v612_v21 = vadd.f32 %v602_v19, %v580_v17 }
 0x289   : > { %v615_v24 = vsel %vm583_vm4, %v577_v52, %v613_v18 }
 0x28a   : > { %1371 = vrcp.f32 %v615_v24  ;;  %v614_v27 = vsel %vm582_vm5, %v572_v54, %v612_v21  ;;  %v617_v28 = vmul.f32 %v615_v24, %v323_v20 }
 0x28b   : > { %1373 = vlog2.f32 %v615_v24  ;;  %v616_v30 = vmul.f32 %v614_v27, %v322_v22 }
 0x28c   : > { %1375 = vrcp.f32 %v614_v27  ;;  %v619_v31 = vadd.f32 %v617_v28, %v567_v26 }
 0x28d   : > { %v618_v32 = vadd.f32 %v616_v30, %v562_v29  ;;  %1377 = vlog2.f32 %v614_v27 }
 0x28e   : > { %v623_v33 = vsub.f32 %v619_v31, %v567_v26  ;;  %961 = vst [vmem:[%s1929_s29 + $0x8] sm:$0xff] %v619_v31 }
 0x28f   : > { %v622_v34 = vsub.f32 %v618_v32, %v562_v29  ;;  %v1265_v35 = vpack.c.bf16 %v619_v31, %v618_v32  ;;  %960 = vst [vmem:[%s1929_s29] sm:$0xff] %v618_v32 }
 0x291   : > { %1266 = vmatprep.subr.bf16.mxu0 %v1265_v35 }
 0x292   : > { %1268 = vmatpush3.bf16.msra.mxu0 %v1265_v35 }
 0x294   : > { %v1372_v38 = vpop.eup %1371 }
 0x295   : > { %v1374_v39 = vpop.eup %1373  ;;  %v625_v40 = vmul.f32 %v1372_v38, %v623_v33  ;;  %1234 = vmatmul.mubr.msk.f32.vlgmr.msra.gmra.mrb[4].mxu0 %vm360_vm0, %v646_v36 }
 0x296   : > { %v1376_v41 = vpop.eup %1375  ;;  %1236 = vmatprep.mubr.msk.f32.mxu0 %vm360_vm0, %v647_v37  ;;  %v633_v46 = vmul.f32 0.6931472, %v1374_v39 }
 0x297   : > { %v624_v43 = vmul.f32 %v1376_v41, %v622_v34  ;;  %v627_v44 = vmul.f32 -0.5, %v625_v40  ;;  %v1378_v45 = vpop.eup %1377 }
 0x298   : > { %v631_v49 = vmul.f32 0.6931472, %v1378_v45 }
 0x299   : > { %v626_v47 = vmul.f32 -0.5, %v624_v43  ;;  %v629_v48 = vmul.f32 %v627_v44, %v625_v40  ;;  %1237 = vmatmul.mubr.msk.f32.gmra.mrb[6].mxu0 %vm360_vm0, %v648_v42 }
 0x29b   : > { %v628_v50 = vmul.f32 %v626_v47, %v624_v43  ;;  %v635_v51 = vsub.f32 %v629_v48, %v633_v46 }
 0x29d   : > { %v634_v52 = vsub.f32 %v628_v50, %v631_v49  ;;  %v1161_v53 = vadd.f32 -0.9189385, %v635_v51 }
 0x29f   : > { %v1160_v54 = vadd.f32 -0.9189385, %v634_v52 }
 0x2a1   : > { %v1936_v55 = vadd.f32 %v1161_v53, %v1160_v54 }
 0x368   : > { %v1235_v59 = vpop.f32.mrb[4].mxu0 }
 0x369   : > { %v765_v60 = vadd.f32 %v1235_v59, %v669_v57  ;;  %v759_v61 = vpop.f32.mrb[5].mxu0 }
 0x36a   : > { %v760_v62 = vadd.f32 %v759_v61, %v664_v58 }
 0x36b   : > { %v779_v63 = vmax.f32 %v765_v60, 0.0 }
 0x36c   : > { %v778_v3 = vmax.f32 %v760_v62, 0.0  ;;  %v1238_v4 = vpop.f32.mrb[6].mxu0 }
 0x36d   : > { %v775_v6 = vadd.f32 %v1238_v4, %v679_v0  ;;  %v769_v7 = vpop.f32.mrb[7].mxu0 }
 0x36e   : > { %v1269_v8 = vpack.c.bf16 %v779_v63, %v778_v3  ;;  %v770_v9 = vadd.f32 %v769_v7, %v674_v5 }
 0x36f   : > { %v781_v10 = vmax.f32 %v775_v6, 0.0 }
 0x370   : > { %v780_v11 = vmax.f32 %v770_v9, 0.0  ;;  %1270 = vmatprep.subr.bf16.mxu1 %v1269_v8 }
 0x371   : > { %1272 = vmatpush3.bf16.msra.mxu1 %v1269_v8 }
 0x372   : > { %v1273_v12 = vpack.c.bf16 %v781_v10, %v780_v11 }
 0x374   : > { %1274 = vmatprep.subr.bf16.mxu1 %v1273_v12 }
 0x375   : > { %1276 = vmatpush3.bf16.msra.mxu1 %v1273_v12 }
 0x378   : > { %1248 = vmatmul.mubr.msk.f32.vlgmr.msra.gmra.mrb[4].mxu1 %vm482_vm1, %v654_v13 }
 0x379   : > { %1250 = vmatprep.mubr.msk.f32.mxu1 %vm482_vm1, %v655_v14 }
 0x37c   : > { %1251 = vmatmul.mubr.msk.f32.gmra.mrb[6].mxu1 %vm482_vm1, %v656_v15 }
 0x37d   : > { %1524 = shalt.err (!%p1521_p10)
}
 0x37e   : > { %s1525_s16 = scalar_lea.hbm %s1949_s12, 256  ;;  %s1529_s13 = scalar_lea.hbm %s2032_s4, 512 }
 0x37f   : > { %p1526_p3 = scmp.ne.s32.totalorder %s1949_s12, %s1525_s16  ;;  %p1530_p1 = scmp.lt.u32.totalorder %s1949_s12, %s2032_s4 }
 0x380   : > { %p1531_p4 = scmp.lt.u32.totalorder %s1529_s13, %s1525_s16  ;;  %p1533_p2 = scmp.lt.u32.totalorder %s1525_s16, %s1949_s12 }
 0x381   : > { %p1527_p7 = pnand %p1526_p3, %p2066_p5 }
 0x382   : > { %p1532_p0 = por %p1531_p4, %p1530_p1 }
 0x383   : > { %p1528_p8 = pneg %p1527_p7 }
 0x384   : > { %p1534_p11 = por %p1533_p2, %p1532_p0 }
 0x386   : > { %p1535_p12 = pnand %p1534_p11, %p1528_p8 }
 0x388   : > { %1538 = shalt.err (!%p1535_p12)
}
 0x389   : > { %s1632_s11 = smov 128   ;;  %s1633_s29 = smov 256   ;;  %v800_v18 = vpop.permute.xlu1 %799  ;;  %v795_v20 = vpop.permute.xlu0 %794  ;;  %v639_v9 = vrot.slane %v1936_v55, 4 }
 0x38a   : > { %s1634_s14 = smov 8   ;;  %s319_s28 = scalar_lea.vmem [#allocation11], %s1884_s3 }
 0x38b   : > { %1289 = dma.vmem_to_hbm [thread:$0]  (%p2066_p5), %s1943_s25, 256, %s1949_s12, %s965_s26, %s1632_s11, %s1633_s29, %s1634_s14   ;;  %v640_v14 = vadd.f32 %v639_v9, %v1936_v55 }
 0x38c   : > { %s1174_s25 = sshll.u32 %s1687_s22, 4  ;;  %s997_s8 = sshll.u32 %s319_s28, 4  ;;  %s1986_s8 = int_to_ptr.vmem [resolvable:$true] %s997_s8 }
 0x38d   : > { %v790_v54 = vpop.permute.xlu1 %789  ;;  %v785_v57 = vpop.permute.xlu0 %784  ;;  %s1984_s10 = scalar_lea.hbm %s2033_s5, %s1174_s25  ;;  %s970_s0 = scalar_lea.sflag [#allocation12], %s1884_s3 }
 0x38e   : > { %s1539_s23 = scalar_lea.vmem %s1986_s8, 16  ;;  %s1635_s22 = smov [#allocation11]  }
 0x38f   : > { %p1540_p6 = scmp.ne.s32.totalorder %s1986_s8, %s1539_s23  ;;  %s1543_s17 = sshll.u32 %s1635_s22, 4  ;;  %s1544_s17 = int_to_ptr.vmem [resolvable:$false] %s1543_s17 }
 0x390   : > { %s1545_s16 = scalar_lea.vmem %s1544_s17, 32  ;;  %p1546_p10 = scmp.lt.s32.totalorder %s1986_s8, %s1544_s17 }
 0x391   : > { %p1541_p13 = pnand %p1540_p6, %p2066_p5  ;;  %p1547_p3 = scmp.lt.s32.totalorder %s1545_s16, %s1539_s23 }
 0x393   : > { %p1542_p9 = pneg %p1541_p13  ;;  %p1548_p7 = por %p1547_p3, %p1546_p10 }
 0x395   : > { %p1549_p8 = pnand %p1548_p7, %p1542_p9 }
 0x44b   : > { %v1249_v16 = vpop.f32.mrb[4].mxu1 }
 0x44c   : > { %v880_v17 = vpop.f32.mrb[5].mxu1  ;;  %v886_v56 = vadd.f32 %v1249_v16, %v790_v54  ;;  %v641_v16 = vrot.slane %v640_v14, 2 }
 0x44d   : > { %v881_v58 = vadd.f32 %v880_v17, %v785_v57 }
 0x44e   : > { %v938_v59 = vsub.f32 %v1911_v2, %v886_v56 }
 0x44f   : > { %v1252_v19 = vpop.f32.mrb[6].mxu1  ;;  %v937_v62 = vsub.f32 %v1909_v1, %v881_v58 }
 0x450   : > { %v896_v21 = vadd.f32 %v1252_v19, %v800_v18  ;;  %v890_v22 = vpop.f32.mrb[7].mxu1  ;;  %v642_v18 = vadd.f32 %v641_v16, %v640_v14 }
 0x451   : > { %v891_v23 = vadd.f32 %v890_v22, %v795_v20 }
 0x452   : > { %v906_v24 = vand.u32 2147483647, %v896_v21  ;;  %v900_v44 = vmax.f32 %v896_v21, 0.0  ;;  %vm902_vm8 = vcmp.ne.f32.partialorder %v896_v21, %v896_v21 }
 0x453   : > { %v905_v25 = vand.u32 2147483647, %v891_v23  ;;  %v899_v48 = vmax.f32 %v891_v23, 0.0  ;;  %vm901_vm9 = vcmp.ne.f32.partialorder %v891_v23, %v891_v23 }
 0x454   : > { %v908_v26 = vsub.f32 0.0, %v906_v24 }
 0x455   : > { %v907_v27 = vsub.f32 0.0, %v905_v25 }
 0x456   : > { %v911_v28 = vmul.f32 1.442695, %v908_v26 }
 0x457   : > { %v909_v29 = vmul.f32 1.442695, %v907_v27 }
 0x458   : > { %1379 = vpow2.f32 %v911_v28 }
 0x459   : > { %1381 = vpow2.f32 %v909_v29 }
 0x462   : > { %v1380_v30 = vpop.eup %1379 }
 0x463   : > { %v1382_v31 = vpop.eup %1381  ;;  %v922_v32 = vadd.f32 1.0, %v1380_v30  ;;  %v925_v34 = vmul.f32 -0.5, %v1380_v30  ;;  %v928_v37 = vand.u32 2147483647, %v1380_v30 }
 0x464   : > { %v913_v33 = vadd.f32 1.0, %v1382_v31  ;;  %v916_v35 = vmul.f32 -0.5, %v1382_v31  ;;  %v919_v39 = vand.u32 2147483647, %v1382_v31 }
 0x465   : > { %1383 = vlog2.f32 %v922_v32  ;;  %v926_v36 = vadd.f32 1.0, %v925_v34  ;;  %vm929_vm6 = vcmp.lt.f32.partialorder %v928_v37, 0.0004427343 }
 0x466   : > { %1385 = vlog2.f32 %v913_v33  ;;  %v917_v38 = vadd.f32 1.0, %v916_v35  ;;  %vm920_vm7 = vcmp.lt.f32.partialorder %v919_v39, 0.0004427343 }
 0x467   : > { %v927_v43 = vmul.f32 %v1380_v30, %v926_v36 }
 0x468   : > { %v918_v46 = vmul.f32 %v1382_v31, %v917_v38 }
 0x46f   : > { %v1384_v40 = vpop.eup %1383 }
 0x470   : > { %v1386_v41 = vpop.eup %1385  ;;  %v924_v42 = vmul.f32 0.6931472, %v1384_v40 }
 0x471   : > { %v915_v45 = vmul.f32 0.6931472, %v1386_v41 }
 0x472   : > { %v930_v47 = vsel %vm929_vm6, %v927_v43, %v924_v42 }
 0x473   : > { %v932_v49 = vadd.f32 %v930_v47, %v900_v44  ;;  %v921_v50 = vsel %vm920_vm7, %v918_v46, %v915_v45 }
 0x474   : > { %v931_v51 = vadd.f32 %v921_v50, %v899_v48 }
 0x475   : > { %v934_v52 = vsel %vm902_vm8, %v896_v21, %v932_v49  ;;  %v643_v21 = vrot.slane %v642_v18, 1 }
 0x476   : > { %1387 = vrcp.f32 %v934_v52  ;;  %v933_v53 = vsel %vm901_vm9, %v891_v23, %v931_v51 }
 0x477   : > { %1389 = vlog2.f32 %v934_v52  ;;  %v644_v24 = vadd.f32 %v643_v21, %v642_v18 }
 0x478   : > { %1391 = vrcp.f32 %v933_v53 }
 0x479   : > { %1393 = vlog2.f32 %v933_v53 }
 0x480   : > { %v1388_v60 = vpop.eup %1387 }
 0x481   : > { %v1390_v61 = vpop.eup %1389  ;;  %v940_v63 = vmul.f32 %v1388_v60, %v938_v59 }
 0x482   : > { %v1392_v0 = vpop.eup %1391  ;;  %v948_v7 = vmul.f32 0.6931472, %v1390_v61 }
 0x483   : > { %v942_v3 = vmul.f32 -0.5, %v940_v63  ;;  %v939_v4 = vmul.f32 %v1392_v0, %v937_v62  ;;  %v1394_v5 = vpop.eup %1393 }
 0x484   : > { %v946_v12 = vmul.f32 0.6931472, %v1394_v5 }
 0x485   : > { %v944_v6 = vmul.f32 %v942_v3, %v940_v63  ;;  %v941_v8 = vmul.f32 -0.5, %v939_v4 }
 0x487   : > { %v950_v10 = vsub.f32 %v944_v6, %v948_v7  ;;  %v943_v11 = vmul.f32 %v941_v8, %v939_v4 }
 0x489   : > { %v1171_v2 = vadd.f32 -0.9189385, %v950_v10  ;;  %v949_v13 = vsub.f32 %v943_v11, %v946_v12 }
 0x48b   : > { %v1170_v1 = vadd.f32 -0.9189385, %v949_v13 }
 0x48d   : > { %v953_v15 = vadd.f32 %v1171_v2, %v1170_v1 }
 0x48f   : > { %v954_v17 = vrot.slane %v953_v15, 4 }
 0x491   : > { %v955_v19 = vadd.f32 %v954_v17, %v953_v15 }
 0x493   : > { %v956_v20 = vrot.slane %v955_v19, 2 }
 0x495   : > { %v957_v22 = vadd.f32 %v956_v20, %v955_v19 }
 0x497   : > { %v958_v23 = vrot.slane %v957_v22, 1 }
 0x499   : > { %v959_v25 = vadd.f32 %v958_v23, %v957_v22 }
 0x49b   : > { %v962_v26 = vsub.f32 %v644_v24, %v959_v25 }
 0x49d   : > { %963 = vst [vmem:[%s319_s28] sm:$0x1] %v962_v26 }
 0x49e   : > { %1552 = shalt.err (!%p1549_p8)
}
 0x49f   : > { %s1553_s3 = scalar_lea.hbm %s1984_s10, 16  ;;  %s1557_s13 = scalar_lea.hbm %s2033_s5, 32 }
 0x4a0   : > { %p1554_p1 = scmp.ne.s32.totalorder %s1984_s10, %s1553_s3  ;;  %p1558_p2 = scmp.lt.u32.totalorder %s1984_s10, %s2033_s5 }
 0x4a1   : > { %p1559_p11 = scmp.lt.u32.totalorder %s1557_s13, %s1553_s3  ;;  %p1561_p6 = scmp.lt.u32.totalorder %s1553_s3, %s1984_s10 }
 0x4a2   : > { %p1555_p4 = pnand %p1554_p1, %p2066_p5 }
 0x4a3   : > { %p1560_p12 = por %p1559_p11, %p1558_p2 }
 0x4a4   : > { %p1556_p0 = pneg %p1555_p4 }
 0x4a5   : > { %p1562_p13 = por %p1561_p6, %p1560_p12 }
 0x4a7   : > { %p1563_p9 = pnand %p1562_p13, %p1556_p0 }
 0x4a9   : > { %1566 = shalt.err (!%p1563_p9)
}
 0x4aa   : > { %1290 = dma.vmem_to_hbm [thread:$0]  (%p2066_p5), %s1986_s8, 16, %s1984_s10, %s970_s0  }
 0x4ab PF: > { %s1009_s11 = sand.u32 1, %s1609_s18   ;;  %p2067_p10 = scmp.ne.s32.totalorder %s2048_s6, 0 }
 0x4ac   : > { %p2068_p3 = scmp.ge.s32.totalorder %s1621_s21, 2  ;;  %s1010_s29 = scalar_lea.sflag [#allocation4], %s1009_s11 }
 0x4ae   : > { %p1308_p7 = pnand %p2068_p3, %p2067_p10 }
 0x4b0   : > { %1600 = dma.done.wait (!%p1308_p7), %s1010_s29, 256  }
 0x4b1   : > { %1602 = vsyncadd (!%p1308_p7), %s1010_s29, 4294967040  ;;  %s1019_s14 = scalar_lea.sflag [#allocation12], %s1009_s11 }
 0x4b2   : > { %1604 = dma.done.wait (!%p1308_p7), %s1019_s14, 16  }
 0x4b3   : > { %1606 = vsyncadd (!%p1308_p7), %s1019_s14, 4294967280  ;;  %p26_p5 = scmp.ge.s32.totalorder %s1691_s24, 4   ;;  %s2069_s18 = smov %s1613_s19 }
 0x4b4   : > { %s2070_s19 = smov %s1617_s20  ;;  %s2071_s20 = smov %s1703_s27 }
 0x4b5   : > { %s2072_s21 = smov %s1691_s24  ;;  %28 = sbr.rel (!%p26_p5) target bundleno = 14 (0xe), region = 119 }
 0x4bc   :  { %1023 = vsyncpa [#allocation3], 1 }
 0x4bd   :  { %1025 = vsyncpa [#allocation3 + $0x1], 1 }
 0x4be   :  { %1026 = vsyncpa [#allocation6], 1 }
 0x4bf   :  { %1028 = vsyncpa [#allocation6 + $0x1], 1 }
 0x4c0   :  { %1029 = vsyncpa [#allocation9], 1 }
 0x4c1   :  { %1030 = vsyncpa [#allocation4], 1 }
 0x4c2   :  { %1032 = vsyncpa [#allocation4 + $0x1], 1 }
 0x4c3   :  { %1033 = vsyncpa [#allocation12], 1 }
 0x4c4   :  { %1035 = vsyncpa [#allocation12 + $0x1], 1 }

</bundles_post_ra>
